<compile_context>
chip_gen: v7x
topology: tpu7x:2x2x1
jax: 0.10.0
libtpu: 0.0.40
codegen_flags: <defaults>
</compile_context>

<pallas_src>
import math
from functools import partial
from typing import Any, NamedTuple

import jax
import jax.numpy as jnp
import numpy as np
from jax.experimental import pallas as pl
from jax.experimental.pallas import tpu as pltpu


def _round_up(v: int, m: int) -> int:
    return (v + m - 1) // m * m


def _vmem_budget_bytes() -> int:
    """Generation-aware scoped-VMEM budget (headroom under physical VMEM)."""
    cap = 64 << 20  # conservative fallback = v7x per-TensorCore physical VMEM
    try:
        info = pltpu.get_tpu_info()
        cap = int(getattr(info, "vmem_capacity_bytes", cap))
    except Exception:
        pass
    # 75% of physical, never above 100 MiB (legal on every generation).
    return int(min(cap * 3 // 4, 100 << 20))


def _footprint_bytes(tn: int, tile_h: int, k_in_p: int, h_p: int, w_itemsize: int) -> int:
    """Rough per-step VMEM footprint estimate used to pick tile sizes."""
    nh = h_p // tile_h
    w_bufs = 1 if nh == 1 else 2
    w = (k_in_p + h_p) * 3 * tile_h * w_itemsize * w_bufs
    b = 2 * 3 * tile_h * 4 * w_bufs
    acts = tn * (k_in_p + h_p) * 4 * 2          # x, h double-buffered (f32)
    out = tn * tile_h * 4 * 2                   # output double-buffered (f32)
    tmp = tn * 3 * tile_h * 4 * 4               # y_ih / y_hh / gate temporaries (rough)
    return w + b + acts + out + tmp


class PackedGRUParams(NamedTuple):
    w_ih: Any          # (K_in_pad, nh * 3 * tile_h)   compute dtype, gates [r|z|n] per H tile
    w_hh: Any          # (H_pad,    nh * 3 * tile_h)   compute dtype
    b_ih: Any          # (1, nh * 3 * tile_h)          f32
    b_hh: Any          # (1, nh * 3 * tile_h)          f32
    input_size: int
    hidden_size: int
    k_in_pad: int
    h_pad: int
    tile_h: int
    compute_dtype: Any


def pack_spiking_gru_params(w_ih, w_hh, b_ih=None, b_hh=None, *,
                            compute_dtype=jnp.bfloat16,
                            tile_h=None,
                            batch_tile_hint: int = 256,
                            vmem_budget_bytes=None) -> PackedGRUParams:
    """Repack PyTorch-layout GRU parameters once (hoist out of per-timestep calls)."""
    f32 = jnp.float32
    w_ih = jnp.asarray(w_ih, f32)
    w_hh = jnp.asarray(w_hh, f32)
    H = w_hh.shape[1]
    K_in = w_ih.shape[1]
    assert w_ih.shape[0] == 3 * H and w_hh.shape[0] == 3 * H
    if b_ih is None:
        b_ih = jnp.zeros((3 * H,), f32)
    if b_hh is None:
        b_hh = jnp.zeros((3 * H,), f32)
    b_ih = jnp.asarray(b_ih, f32)
    b_hh = jnp.asarray(b_hh, f32)

    K_in_p = _round_up(max(K_in, 1), 128)
    H_p = _round_up(max(H, 1), 128)
    w_itemsize = jnp.dtype(compute_dtype).itemsize

    if tile_h is None:
        budget = vmem_budget_bytes if vmem_budget_bytes is not None else _vmem_budget_bytes()
        tn_hint = min(_round_up(max(batch_tile_hint, 16), 16), 1024)
        tile_h = 128
        for cand in range(H_p, 127, -128):          # largest H tile that fits the budget
            if H_p % cand == 0 and _footprint_bytes(tn_hint, cand, K_in_p, H_p, w_itemsize) <= budget:
                tile_h = cand
                break
    assert H_p % tile_h == 0 and tile_h % 128 == 0
    nh = H_p // tile_h

    def pad2(a, r, c):
        if a.shape == (r, c):
            return a
        return jnp.pad(a, ((0, r - a.shape[0]), (0, c - a.shape[1])))

    def pack_w(w, k_src, k_pad):
        wg = w.reshape(3, H, k_src)
        wt = [pad2(wg[g].T, k_pad, H_p) for g in range(3)]          # (k_pad, H_p) per gate
        cols = [wt[g][:, j * tile_h:(j + 1) * tile_h]
                for j in range(nh) for g in range(3)]               # per H tile: [r | z | n]
        return jnp.concatenate(cols, axis=1).astype(compute_dtype)  # (k_pad, nh*3*tile_h)

    def pack_b(b):
        bg = b.reshape(3, H)
        bp = [jnp.pad(bg[g], (0, H_p - H)) for g in range(3)]
        cols = [bp[g][j * tile_h:(j + 1) * tile_h]
                for j in range(nh) for g in range(3)]
        return jnp.concatenate(cols).reshape(1, nh * 3 * tile_h)    # f32

    return PackedGRUParams(
        w_ih=pack_w(w_ih, K_in, K_in_p),
        w_hh=pack_w(w_hh, H, H_p),
        b_ih=pack_b(b_ih),
        b_hh=pack_b(b_hh),
        input_size=K_in,
        hidden_size=H,
        k_in_pad=K_in_p,
        h_pad=H_p,
        tile_h=tile_h,
        compute_dtype=jnp.dtype(compute_dtype),
    )


def _spiking_gru_kernel(x_ref, h_ref, w_ih_ref, w_hh_ref, b_ih_ref, b_hh_ref,
                        out_ref, *, tile_h: int, compute_dtype):
    h_f32 = h_ref[...]                                   # exact f32 for the final blend
    # Cast once; matmul operands in compute dtype (bf16 -> MXU peak), f32 accumulation.
    x_c = x_ref[...].astype(compute_dtype)
    h_c = h_f32.astype(compute_dtype)

    # One wide matmul per operand: columns are [r | z | n] for this H tile (3*tile_h lanes).
    y_ih = jnp.dot(x_c, w_ih_ref[...], preferred_element_type=jnp.float32) + b_ih_ref[...]
    y_hh = jnp.dot(h_c, w_hh_ref[...], preferred_element_type=jnp.float32) + b_hh_ref[...]

    r_pre = y_ih[:, :tile_h] + y_hh[:, :tile_h]
    z_pre = y_ih[:, tile_h:2 * tile_h] + y_hh[:, tile_h:2 * tile_h]
    # r, z are exactly {0,1} -> use selects instead of multiplies/casts.
    n_pre = y_ih[:, 2 * tile_h:] + jnp.where(r_pre >= 0.0, y_hh[:, 2 * tile_h:], 0.0)
    n = (n_pre >= 0.0).astype(jnp.float32)

    if tile_h == h_ref.shape[1]:
        h_pass = h_f32                                   # single H tile: whole block
    else:
        off = pl.multiple_of(pl.program_id(1) * tile_h, 128)
        h_pass = h_ref[:, pl.ds(off, tile_h)]            # lane-aligned dynamic slice

    # h_new = (1 - z) * n + z * h  with z in {0,1} -> select.
    out_ref[...] = jnp.where(z_pre >= 0.0, h_pass, n)


def spiking_gru_cell_packed(x, h, params: PackedGRUParams, *,
                            batch_tile: int = 256, vmem_budget_bytes=None):
    """One SpikingGRUCell step from pre-packed parameters. Returns (N, hidden) float32."""
    f32 = jnp.float32
    x = jnp.asarray(x, f32)
    h = jnp.asarray(h, f32)
    N, K_in = x.shape
    assert K_in == params.input_size and h.shape == (N, params.hidden_size)

    K_in_p, H_p, tile_h = params.k_in_pad, params.h_pad, params.tile_h
    nh = H_p // tile_h
    compute_dtype = params.compute_dtype
    w_itemsize = jnp.dtype(compute_dtype).itemsize
    budget = vmem_budget_bytes if vmem_budget_bytes is not None else _vmem_budget_bytes()

    # Batch tile: MXU-friendly multiple of 16 (bf16 sublane packing), shrunk if needed to
    # fit the VMEM budget, and halved once if the grid would otherwise have one iteration
    # (so both v7x TensorCores get work).
    N_su = _round_up(max(N, 1), 8)
    tn = min(_round_up(max(batch_tile, 16), 16), N_su)
    while tn > 8 and _footprint_bytes(tn, tile_h, K_in_p, H_p, w_itemsize) > budget:
        tn = max(8, (tn // 2) // 8 * 8)
    if nh == 1 and tn >= N_su and N_su >= 16:
        tn = _round_up(N_su // 2, 8)
    N_p = _round_up(N_su, tn)

    def pad2(a, r, c):
        if a.shape == (r, c):
            return a
        return jnp.pad(a, ((0, r - a.shape[0]), (0, c - a.shape[1])))

    x_p = pad2(x, N_p, K_in_p)
    h_p_arr = pad2(h, N_p, H_p)

    # Single-buffer the VMEM-resident (constant-index) weights when the second buffer
    # would actually cost meaningful VMEM; tiny weights keep the default double buffer.
    w_block_bytes = (K_in_p + H_p) * 3 * tile_h * w_itemsize
    w_mode = ({"pipeline_mode": pl.Buffered(1)}
              if (nh == 1 and w_block_bytes >= (1 << 20)) else {})

    in_specs = [
        # Activations: streamed per batch tile; H axis innermost -> not re-DMA'd per H tile.
        pl.BlockSpec((tn, K_in_p), lambda i, j: (i, 0)),
        pl.BlockSpec((tn, H_p), lambda i, j: (i, 0)),
        # Weights: constant batch index -> VMEM-resident across batch tiles.
        pl.BlockSpec((K_in_p, 3 * tile_h), lambda i, j: (0, j), **w_mode),
        pl.BlockSpec((H_p, 3 * tile_h), lambda i, j: (0, j), **w_mode),
        pl.BlockSpec((1, 3 * tile_h), lambda i, j: (0, j)),
        pl.BlockSpec((1, 3 * tile_h), lambda i, j: (0, j)),
    ]
    out_spec = pl.BlockSpec((tn, tile_h), lambda i, j: (i, j))

    flops = 2 * N_p * (K_in_p + H_p) * 3 * H_p
    weight_bytes = (params.w_ih.size + params.w_hh.size) * w_itemsize
    weight_reads = 1 if nh == 1 else (N_p // tn)
    bytes_accessed = (N_p * (K_in_p + H_p) * 4
                      + weight_bytes * weight_reads
                      + (params.b_ih.size + params.b_hh.size) * 4 * weight_reads
                      + N_p * H_p * 4)

    kernel = partial(_spiking_gru_kernel, tile_h=tile_h, compute_dtype=compute_dtype)

    out = pl.pallas_call(
        kernel,
        out_shape=jax.ShapeDtypeStruct((N_p, H_p), f32),
        grid=(N_p // tn, nh),
        in_specs=in_specs,
        out_specs=out_spec,
        compiler_params=pltpu.CompilerParams(
            dimension_semantics=("parallel", "parallel"),
            vmem_limit_bytes=int(budget)),
        cost_estimate=pl.CostEstimate(flops=int(flops), transcendentals=0,
                                      bytes_accessed=int(bytes_accessed)),
    )(x_p, h_p_arr, params.w_ih, params.w_hh, params.b_ih, params.b_hh)

    return out[:N, :params.hidden_size]


def spiking_gru_cell(x, h, w_ih, w_hh, b_ih=None, b_hh=None, *,
                     batch_tile: int = 256, compute_dtype=jnp.bfloat16, tile_h=None):
    """Convenience wrapper: pack parameters + run one cell step.

    For sequence loops, call pack_spiking_gru_params() once and reuse it per timestep.
    """
    params = pack_spiking_gru_params(w_ih, w_hh, b_ih, b_hh,
                                     compute_dtype=compute_dtype, tile_h=tile_h,
                                     batch_tile_hint=batch_tile)
    return spiking_gru_cell_packed(x, h, params, batch_tile=batch_tile)


def _reference(x, h, w_ih, w_hh, b_ih, b_hh):
    """Pure-JAX reference mirroring the PyTorch forward."""
    H = h.shape[1]
    y_ih = x @ w_ih.T + b_ih
    y_hh = h @ w_hh.T + b_hh
    heav = lambda v: (v >= 0.0).astype(jnp.float32)
    r = heav(y_ih[:, 0:H] + y_hh[:, 0:H])
    z = heav(y_ih[:, H:2 * H] + y_hh[:, H:2 * H])
    n = heav(y_ih[:, 2 * H:] + r * y_hh[:, 2 * H:])
    return (1.0 - z) * n + z * h


def _make_params(key, input_size, hidden_size):
    kw1, kw2, kb1, kb2 = jax.random.split(key, 4)
    sqrt_k = math.sqrt(1.0 / hidden_size)
    w_ih = jax.random.uniform(kw1, (3 * hidden_size, input_size),
                              minval=-sqrt_k, maxval=sqrt_k, dtype=jnp.float32)
    w_hh = jax.random.uniform(kw2, (3 * hidden_size, hidden_size),
                              minval=-sqrt_k, maxval=sqrt_k, dtype=jnp.float32)
    b_ih = jax.random.uniform(kb1, (3 * hidden_size,),
                              minval=-sqrt_k, maxval=sqrt_k, dtype=jnp.float32)
    b_hh = jax.random.uniform(kb2, (3 * hidden_size,),
                              minval=-sqrt_k, maxval=sqrt_k, dtype=jnp.float32)
    return w_ih, w_hh, b_ih, b_hh


if __name__ == "__main__":
    key = jax.random.PRNGKey(0)

    # --- Test 1: module-default small shapes; forward(x, h=None) -> h0 = zeros. ---
    input_size, hidden_size, batch = 16, 32, 2
    k1, k2, kx1 = jax.random.split(key, 3)
    w_ih, w_hh, b_ih, b_hh = _make_params(k1, input_size, hidden_size)
    x1 = jax.random.normal(kx1, (batch, input_size), dtype=jnp.float32)
    h1 = jnp.zeros((batch, hidden_size), dtype=jnp.float32)

    # f32-operand path: bit-stable heaviside decisions, asserted against the reference.
    out1 = jax.block_until_ready(
        spiking_gru_cell(x1, h1, w_ih, w_hh, b_ih, b_hh, compute_dtype=jnp.float32))
    ref1 = _reference(x1, h1, w_ih, w_hh, b_ih, b_hh)
    np.testing.assert_allclose(np.asarray(out1), np.asarray(ref1), rtol=1e-5, atol=1e-5)

    # Default bf16-operand / f32-accumulate path (MXU peak). Not strictly asserted:
    # bf16 rounding can flip spikes whose pre-activation is ~0.
    out1_bf16 = jax.block_until_ready(spiking_gru_cell(x1, h1, w_ih, w_hh, b_ih, b_hh))
    assert out1_bf16.shape == (batch, hidden_size)
    assert bool(jnp.all(jnp.isfinite(out1_bf16)))

    # --- Test 2: exercise H tiling (nh > 1) and multiple batch tiles, f32, exact check. ---
    input_size2, hidden_size2, batch2 = 24, 160, 20
    k3, kx2, kh2 = jax.random.split(k2, 3)
    w_ih2, w_hh2, b_ih2, b_hh2 = _make_params(k3, input_size2, hidden_size2)
    x2 = jax.random.normal(kx2, (batch2, input_size2), dtype=jnp.float32)
    h2 = jax.random.normal(kh2, (batch2, hidden_size2), dtype=jnp.float32)

    params2 = pack_spiking_gru_params(w_ih2, w_hh2, b_ih2, b_hh2,
                                      compute_dtype=jnp.float32, tile_h=128)
    out2 = jax.block_until_ready(
        spiking_gru_cell_packed(x2, h2, params2, batch_tile=8))
    ref2 = _reference(x2, h2, w_ih2, w_hh2, b_ih2, b_hh2)
    np.testing.assert_allclose(np.asarray(out2), np.asarray(ref2), rtol=1e-5, atol=1e-5)

    print("KERNEL_OK")
</pallas_src>

<mosaic_0001>
module attributes {stable_mosaic.version = 11 : i64} {
  func.func @_spiking_gru_kernel(%arg0: i32, %arg1: i32, %arg2: memref<8x128xf32, #tpu.memory_space<vmem>>, %arg3: memref<8x128xf32, #tpu.memory_space<vmem>>, %arg4: memref<128x384xf32, #tpu.memory_space<vmem>>, %arg5: memref<128x384xf32, #tpu.memory_space<vmem>>, %arg6: memref<1x384xf32, #tpu.memory_space<vmem>>, %arg7: memref<1x384xf32, #tpu.memory_space<vmem>>, %arg8: memref<8x128xf32, #tpu.memory_space<vmem>>) attributes {dimension_semantics = [#tpu.dimension_semantics<parallel>, #tpu.dimension_semantics<parallel>], iteration_bounds = array<i64: 1, 1>, scalar_prefetch = 0 : i64, scratch_operands = 0 : i64, tpu.core_type = #tpu.core_type<tc>, window_params = [{transform_indices = @transform_0, window_bounds = array<i64: 8, 128>}, {transform_indices = @transform_1, window_bounds = array<i64: 8, 128>}, {transform_indices = @transform_2, window_bounds = array<i64: 128, 384>}, {transform_indices = @transform_3, window_bounds = array<i64: 128, 384>}, {transform_indices = @transform_4, window_bounds = array<i64: 1, 384>}, {transform_indices = @transform_5, window_bounds = array<i64: 1, 384>}, {transform_indices = @transform_6, window_bounds = array<i64: 8, 128>}]} {
    %c0 = arith.constant 0 : index
    %c0_0 = arith.constant 0 : index
    %0 = vector.load %arg3[%c0, %c0_0] : memref<8x128xf32, #tpu.memory_space<vmem>>, vector<8x128xf32>
    %c0_1 = arith.constant 0 : index
    %c0_2 = arith.constant 0 : index
    %1 = vector.load %arg2[%c0_1, %c0_2] : memref<8x128xf32, #tpu.memory_space<vmem>>, vector<8x128xf32>
    %c0_3 = arith.constant 0 : index
    %c0_4 = arith.constant 0 : index
    %2 = vector.load %arg4[%c0_3, %c0_4] : memref<128x384xf32, #tpu.memory_space<vmem>>, vector<128x384xf32>
    %cst = arith.constant dense<0.000000e+00> : vector<8x384xf32>
    %3 = tpu.matmul %1, %2, %cst {dimension_numbers = #tpu.dot_dimension_numbers<[1], [0], [0], [1], [0, 0, 1, 1], [], []>} : vector<8x128xf32>, vector<128x384xf32>, vector<8x384xf32> -> vector<8x384xf32>
    %c0_5 = arith.constant 0 : index
    %c0_6 = arith.constant 0 : index
    %4 = vector.load %arg6[%c0_5, %c0_6] : memref<1x384xf32, #tpu.memory_space<vmem>>, vector<1x384xf32>
    %5 = vector.broadcast %4 : vector<1x384xf32> to vector<8x384xf32>
    %6 = arith.addf %3, %5 : vector<8x384xf32>
    %c0_7 = arith.constant 0 : index
    %c0_8 = arith.constant 0 : index
    %7 = vector.load %arg5[%c0_7, %c0_8] : memref<128x384xf32, #tpu.memory_space<vmem>>, vector<128x384xf32>
    %cst_9 = arith.constant dense<0.000000e+00> : vector<8x384xf32>
    %8 = tpu.matmul %0, %7, %cst_9 {dimension_numbers = #tpu.dot_dimension_numbers<[1], [0], [0], [1], [0, 0, 1, 1], [], []>} : vector<8x128xf32>, vector<128x384xf32>, vector<8x384xf32> -> vector<8x384xf32>
    %c0_10 = arith.constant 0 : index
    %c0_11 = arith.constant 0 : index
    %9 = vector.load %arg7[%c0_10, %c0_11] : memref<1x384xf32, #tpu.memory_space<vmem>>, vector<1x384xf32>
    %10 = vector.broadcast %9 : vector<1x384xf32> to vector<8x384xf32>
    %11 = arith.addf %8, %10 : vector<8x384xf32>
    %12 = vector.extract_strided_slice %6 {offsets = [0, 0], sizes = [8, 128], strides = [1, 1]} : vector<8x384xf32> to vector<8x128xf32>
    %13 = vector.extract_strided_slice %11 {offsets = [0, 0], sizes = [8, 128], strides = [1, 1]} : vector<8x384xf32> to vector<8x128xf32>
    %14 = arith.addf %12, %13 : vector<8x128xf32>
    %15 = vector.extract_strided_slice %6 {offsets = [0, 128], sizes = [8, 128], strides = [1, 1]} : vector<8x384xf32> to vector<8x128xf32>
    %16 = vector.extract_strided_slice %11 {offsets = [0, 128], sizes = [8, 128], strides = [1, 1]} : vector<8x384xf32> to vector<8x128xf32>
    %17 = arith.addf %15, %16 : vector<8x128xf32>
    %18 = vector.extract_strided_slice %6 {offsets = [0, 256], sizes = [8, 128], strides = [1, 1]} : vector<8x384xf32> to vector<8x128xf32>
    %cst_12 = arith.constant 0.000000e+00 : f32
    %19 = vector.broadcast %cst_12 : f32 to vector<8x128xf32>
    %20 = arith.cmpf oge, %14, %19 : vector<8x128xf32>
    %21 = vector.extract_strided_slice %11 {offsets = [0, 256], sizes = [8, 128], strides = [1, 1]} : vector<8x384xf32> to vector<8x128xf32>
    %cst_13 = arith.constant 0.000000e+00 : f32
    %22 = vector.broadcast %cst_13 : f32 to vector<8x128xf32>
    %23 = arith.select %20, %21, %22 : vector<8x128xi1>, vector<8x128xf32>
    %24 = arith.addf %18, %23 : vector<8x128xf32>
    %cst_14 = arith.constant 0.000000e+00 : f32
    %25 = vector.broadcast %cst_14 : f32 to vector<8x128xf32>
    %26 = arith.cmpf oge, %24, %25 : vector<8x128xf32>
    %27 = arith.extui %26 : vector<8x128xi1> to vector<8x128xi32>
    %28 = arith.sitofp %27 : vector<8x128xi32> to vector<8x128xf32>
    %cst_15 = arith.constant 0.000000e+00 : f32
    %29 = vector.broadcast %cst_15 : f32 to vector<8x128xf32>
    %30 = arith.cmpf oge, %17, %29 : vector<8x128xf32>
    %31 = arith.select %30, %0, %28 : vector<8x128xi1>, vector<8x128xf32>
    %c0_16 = arith.constant 0 : index
    %c0_17 = arith.constant 0 : index
    %32 = vector.load %arg8[%c0_16, %c0_17] : memref<8x128xf32, #tpu.memory_space<vmem>>, vector<8x128xf32>
    tpu.vector_store %arg8[%c0_16, %c0_17], %31 {strides = array<i32>} : memref<8x128xf32, #tpu.memory_space<vmem>>, vector<8x128xf32>,
    return
  }
  func.func @transform_0(%arg0: i32, %arg1: i32) -> (i32, i32) {
    %c0_i32 = arith.constant 0 : i32
    %c0_i32_0 = arith.constant 0 : i32
    return %arg0, %c0_i32 : i32, i32
  }
  func.func @transform_1(%arg0: i32, %arg1: i32) -> (i32, i32) {
    %c0_i32 = arith.constant 0 : i32
    %c0_i32_0 = arith.constant 0 : i32
    return %arg0, %c0_i32 : i32, i32
  }
  func.func @transform_2(%arg0: i32, %arg1: i32) -> (i32, i32) {
    %c0_i32 = arith.constant 0 : i32
    %c0_i32_0 = arith.constant 0 : i32
    return %c0_i32, %arg1 : i32, i32
  }
  func.func @transform_3(%arg0: i32, %arg1: i32) -> (i32, i32) {
    %c0_i32 = arith.constant 0 : i32
    %c0_i32_0 = arith.constant 0 : i32
    return %c0_i32, %arg1 : i32, i32
  }
  func.func @transform_4(%arg0: i32, %arg1: i32) -> (i32, i32) {
    %c0_i32 = arith.constant 0 : i32
    %c0_i32_0 = arith.constant 0 : i32
    return %c0_i32, %arg1 : i32, i32
  }
  func.func @transform_5(%arg0: i32, %arg1: i32) -> (i32, i32) {
    %c0_i32 = arith.constant 0 : i32
    %c0_i32_0 = arith.constant 0 : i32
    return %c0_i32, %arg1 : i32, i32
  }
  func.func @transform_6(%arg0: i32, %arg1: i32) -> (i32, i32) {
    %c0_i32 = arith.constant 0 : i32
    return %arg0, %arg1 : i32, i32
  }
}

</mosaic_0001>

<bundles_post_ra>
// kernel: tpu_custom_call.1
= control target key start
LH: loop header
LB: loop body
LE: loop exit
PB: predicated region body
PF: predicated region fallthrough
CT: control target
= control target key end

     0   :  { %11 = vsyncpa [#allocation3], 0  ;;  %s1002_s0 = inlined_call_operand.hbm [shape: f32[8,128], index: 0, kind: input, shape index: {}]   ;;  %s1003_s1 = inlined_call_operand.hbm [shape: f32[8,128], index: 1, kind: input, shape index: {}]   ;;  %s1004_s2 = inlined_call_operand.hbm [shape: f32[128,384], index: 2, kind: input, shape index: {}]   ;;  %s1005_s3 = inlined_call_operand.hbm [shape: f32[128,384], index: 3, kind: input, shape index: {}]   ;;  %s1006_s4 = inlined_call_operand.vmem [shape: f32[1,384], index: 4, kind: input, shape index: {}]   ;;  %s1007_s5 = inlined_call_operand.vmem [shape: f32[1,384], index: 5, kind: input, shape index: {}]   ;;  %s1008_s6 = inlined_call_operand.hbm [shape: f32[8,128], index: 6, kind: output, shape index: {}]  }
   0x1   :  { %12 = vsyncpa [#allocation6], 0 }
   0x2   :  { %13 = vsyncpa [#allocation9], 0 }
   0x3   :  { %14 = vsyncpa [#allocation4], 0  ;;  %s868_s21 = smov [#allocation5]   ;;  %s869_s23 = smov [#allocation2]  }
   0x4   :  { %s31_s22 = sshll.u32 %s868_s21, 4  ;;  %s21_s24 = sshll.u32 %s869_s23, 4  ;;  %s32_s22 = int_to_ptr.vmem [resolvable:$true] %s31_s22  ;;  %s22_s24 = int_to_ptr.vmem [resolvable:$true] %s21_s24 }
   0x5   :  { %s750_s27 = scalar_lea.hbm %s1003_s1, 128 }
   0x6   :  { %p751_p0 = scmp.ne.s32.totalorder %s1003_s1, %s750_s27  ;;  %p754_p1 = scmp.lt.u32.totalorder %s750_s27, %s1003_s1 }
   0x8   :  { %p756_p2 = pnand %p754_p1, %p751_p0 }
   0xa   :  { %759 = shalt.err (!%p756_p2)
}
   0xb   :  { %s760_s8 = scalar_lea.vmem %s32_s22, 128  ;;  %p765_p4 = scmp.lt.s32.totalorder %s32_s22, %s32_s22 }
   0xc   :  { %p761_p3 = scmp.ne.s32.totalorder %s32_s22, %s760_s8  ;;  %p766_p5 = scmp.lt.s32.totalorder %s760_s8, %s760_s8 }
   0xe   :  { %p767_p6 = por %p766_p5, %p765_p4 }
  0x10   :  { %p768_p7 = pnand %p767_p6, %p761_p3 }
  0x12   :  { %771 = shalt.err (!%p768_p7)
}
  0x13   :  { %34 = dma.hbm_to_vmem [thread:$0]  %s1003_s1, 128, %s32_s22, [#allocation6]  }
  0x14   :  { %s772_s13 = scalar_lea.hbm %s1002_s0, 128 }
  0x15   :  { %p773_p8 = scmp.ne.s32.totalorder %s1002_s0, %s772_s13  ;;  %p776_p9 = scmp.lt.u32.totalorder %s772_s13, %s1002_s0 }
  0x17   :  { %p778_p10 = pnand %p776_p9, %p773_p8 }
  0x19   :  { %781 = shalt.err (!%p778_p10)
}
  0x1a   :  { %s782_s18 = scalar_lea.vmem %s22_s24, 128  ;;  %p787_p12 = scmp.lt.s32.totalorder %s22_s24, %s22_s24 }
  0x1b   :  { %p783_p11 = scmp.ne.s32.totalorder %s22_s24, %s782_s18  ;;  %p788_p13 = scmp.lt.s32.totalorder %s782_s18, %s782_s18 }
  0x1d   :  { %p789_p0 = por %p788_p13, %p787_p12 }
  0x1f   :  { %p790_p1 = pnand %p789_p0, %p783_p11 }
  0x21   :  { %793 = shalt.err (!%p790_p1)
}
  0x22   :  { %24 = dma.hbm_to_vmem [thread:$0]  %s1002_s0, 128, %s22_s24, [#allocation3]  }
  0x23   :  { %s870_s20 = smov [#allocation7]   ;;  %s794_s25 = scalar_lea.hbm %s1004_s2, 6144 }
  0x24   :  { %s40_s21 = sshll.u32 %s870_s20, 4  ;;  %p795_p2 = scmp.ne.s32.totalorder %s1004_s2, %s794_s25  ;;  %s41_s21 = int_to_ptr.vmem [resolvable:$true] %s40_s21 }
  0x25   :  { %p798_p3 = scmp.lt.u32.totalorder %s794_s25, %s1004_s2 }
  0x27   :  { %p800_p4 = pnand %p798_p3, %p795_p2 }
  0x29   :  { %803 = shalt.err (!%p800_p4)
}
  0x2a   :  { %s804_s30 = scalar_lea.vmem %s41_s21, 6144  ;;  %p809_p6 = scmp.lt.s32.totalorder %s41_s21, %s41_s21 }
  0x2b   :  { %p805_p5 = scmp.ne.s32.totalorder %s41_s21, %s804_s30  ;;  %p810_p7 = scmp.lt.s32.totalorder %s804_s30, %s804_s30 }
  0x2d   :  { %p811_p8 = por %p810_p7, %p809_p6 }
  0x2f   :  { %p812_p9 = pnand %p811_p8, %p805_p5 }
  0x31   :  { %815 = shalt.err (!%p812_p9)
}
  0x32   :  { %s871_s0 = smov 384   ;;  %s872_s24 = smov 24  }
  0x33   :  { %46 = dma.hbm_to_vmem [thread:$0]  %s1004_s2, 6144, %s41_s21, [#allocation6], %s871_s0, %s871_s0, %s872_s24  }
  0x34   :  { %s873_s9 = smov [#allocation8]   ;;  %s816_s13 = scalar_lea.hbm %s1005_s3, 6144 }
  0x35   :  { %s52_s10 = sshll.u32 %s873_s9, 4  ;;  %p817_p10 = scmp.ne.s32.totalorder %s1005_s3, %s816_s13  ;;  %s53_s10 = int_to_ptr.vmem [resolvable:$true] %s52_s10 }
  0x36   :  { %p820_p11 = scmp.lt.u32.totalorder %s816_s13, %s1005_s3 }
  0x38   :  { %p822_p12 = pnand %p820_p11, %p817_p10 }
  0x3a   :  { %825 = shalt.err (!%p822_p12)
}
  0x3b   :  { %s826_s18 = scalar_lea.vmem %s53_s10, 6144  ;;  %p831_p0 = scmp.lt.s32.totalorder %s53_s10, %s53_s10 }
  0x3c   :  { %p827_p13 = scmp.ne.s32.totalorder %s53_s10, %s826_s18  ;;  %p832_p1 = scmp.lt.s32.totalorder %s826_s18, %s826_s18 }
  0x3e   :  { %p833_p2 = por %p832_p1, %p831_p0 }
  0x40   :  { %p834_p3 = pnand %p833_p2, %p827_p13 }
  0x42   :  { %837 = shalt.err (!%p834_p3)
}
  0x43   :  { %58 = dma.hbm_to_vmem [thread:$0]  %s1005_s3, 6144, %s53_s10, [#allocation9], %s871_s0, %s871_s0, %s872_s24  }
  0x44   :  { %860 = dma.done.wait [#allocation3], 128  }
  0x45   :  { %861 = vsyncadd [#allocation3], 4294967168 }
  0x46   :  { %862 = dma.done.wait [#allocation6], 6272  }
  0x47   :  { %863 = vsyncadd [#allocation6], 4294961024 }
  0x48   :  { %864 = dma.done.wait [#allocation9], 6144  }
  0x49   :  { %865 = vsyncadd [#allocation9], 4294961152  ;;  %v874_v0 = vmov 0.0|0.0   ;;  %v875_v1 = vmov 0.0   ;;  %vm876_vm0 = vmmov 0   ;;  %v78_v2 = vld [vmem:[#allocation7 + $0x8] sm:$0xff] }
  0x4a   :  { %654 = vmatprep.subr.bf16.mxu1 %v874_v0  ;;  %206 = vmatprep.mubr.f32.mxu0 %v875_v1  ;;  %v81_v3 = vld [vmem:[#allocation7 + $0x20] sm:$0xff]  ;;  %v80_v6 = vld [vmem:[#allocation7 + $0x18] sm:$0xff]  ;;  %v79_v7 = vld [vmem:[#allocation7 + $0x10] sm:$0xff] }
  0x4b   :  { %584 = vmatprep.mubr.msk.f32.mxu1 %vm876_vm0, %v875_v1  ;;  %v77_v4 = vld [vmem:[#allocation7] sm:$0xff]  ;;  %v622_v5 = vpack.c.bf16 %v81_v3, %v78_v2  ;;  %v82_v8 = vld [vmem:[#allocation7 + $0x28] sm:$0xff]  ;;  %v84_v11 = vld [vmem:[#allocation7 + $0x38] sm:$0xff] }
  0x4c   :  { %v624_v9 = vpack.c.bf16 %v80_v6, %v77_v4  ;;  %v655_v10 = vpack.c.bf16 %v82_v8, %v79_v7  ;;  %v87_v12 = vld [vmem:[#allocation7 + $0x50] sm:$0xff]  ;;  %v86_v15 = vld [vmem:[#allocation7 + $0x48] sm:$0xff]  ;;  %v85_v16 = vld [vmem:[#allocation7 + $0x40] sm:$0xff] }
  0x4d   :  { %v83_v13 = vld [vmem:[#allocation7 + $0x30] sm:$0xff]  ;;  %623 = vmatprep.subr.bf16.mxu0 %v622_v5  ;;  %v626_v14 = vpack.c.bf16 %v87_v12, %v84_v11  ;;  %v88_v17 = vld [vmem:[#allocation7 + $0x58] sm:$0xff]  ;;  %v90_v20 = vld [vmem:[#allocation7 + $0x68] sm:$0xff] }
  0x4e   :  { %625 = vmatpush1.bf16.msra.mxu0 %v624_v9  ;;  %656 = vmatpush3.bf16.msra.mxu1 %v655_v10  ;;  %v628_v18 = vpack.c.bf16 %v86_v15, %v83_v13  ;;  %v658_v19 = vpack.c.bf16 %v88_v17, %v85_v16  ;;  %v93_v21 = vld [vmem:[#allocation7 + $0x80] sm:$0xff]  ;;  %v92_v24 = vld [vmem:[#allocation7 + $0x78] sm:$0xff]  ;;  %v91_v25 = vld [vmem:[#allocation7 + $0x70] sm:$0xff] }
  0x4f   :  { %v89_v22 = vld [vmem:[#allocation7 + $0x60] sm:$0xff]  ;;  %627 = vmatprep.subr.bf16.mxu0 %v626_v14  ;;  %657 = vmatprep.subr.bf16.mxu1 %v874_v0  ;;  %v630_v23 = vpack.c.bf16 %v93_v21, %v90_v20  ;;  %v94_v26 = vld [vmem:[#allocation7 + $0x88] sm:$0xff]  ;;  %v96_v27 = vld [vmem:[#allocation7 + $0x98] sm:$0xff] }
  0x50   :  { %v99_v28 = vld [vmem:[#allocation7 + $0xb0] sm:$0xff]  ;;  %v632_v29 = vpack.c.bf16 %v92_v24, %v89_v22  ;;  %v661_v30 = vpack.c.bf16 %v94_v26, %v91_v25  ;;  %v98_v33 = vld [vmem:[#allocation7 + $0xa8] sm:$0xff]  ;;  %v97_v34 = vld [vmem:[#allocation7 + $0xa0] sm:$0xff] }
  0x51   :  { %v95_v31 = vld [vmem:[#allocation7 + $0x90] sm:$0xff]  ;;  %v634_v32 = vpack.c.bf16 %v99_v28, %v96_v27  ;;  %v100_v35 = vld [vmem:[#allocation7 + $0xb8] sm:$0xff]  ;;  %v102_v36 = vld [vmem:[#allocation7 + $0xc8] sm:$0xff] }
  0x52   :  { %629 = vmatpush1.bf16.msra.mxu0 %v628_v18  ;;  %659 = vmatpush3.bf16.msra.mxu1 %v658_v19  ;;  %v105_v37 = vld [vmem:[#allocation7 + $0xe0] sm:$0xff]  ;;  %v636_v38 = vpack.c.bf16 %v98_v33, %v95_v31  ;;  %v664_v39 = vpack.c.bf16 %v100_v35, %v97_v34  ;;  %v104_v42 = vld [vmem:[#allocation7 + $0xd8] sm:$0xff]  ;;  %v103_v43 = vld [vmem:[#allocation7 + $0xd0] sm:$0xff] }
  0x53   :  { %631 = vmatprep.subr.bf16.mxu0 %v630_v23  ;;  %660 = vmatprep.subr.bf16.mxu1 %v874_v0  ;;  %v101_v40 = vld [vmem:[#allocation7 + $0xc0] sm:$0xff]  ;;  %v638_v41 = vpack.c.bf16 %v105_v37, %v102_v36  ;;  %v106_v44 = vld [vmem:[#allocation7 + $0xe8] sm:$0xff]  ;;  %v108_v45 = vld [vmem:[#allocation7 + $0xf8] sm:$0xff] }
  0x54   :  { %v111_v46 = vld [vmem:[#allocation7 + $0x110] sm:$0xff]  ;;  %v640_v47 = vpack.c.bf16 %v104_v42, %v101_v40  ;;  %v667_v48 = vpack.c.bf16 %v106_v44, %v103_v43  ;;  %v110_v51 = vld [vmem:[#allocation7 + $0x108] sm:$0xff]  ;;  %v109_v52 = vld [vmem:[#allocation7 + $0x100] sm:$0xff] }
  0x55   :  { %v107_v49 = vld [vmem:[#allocation7 + $0xf0] sm:$0xff]  ;;  %v642_v50 = vpack.c.bf16 %v111_v46, %v108_v45  ;;  %v112_v53 = vld [vmem:[#allocation7 + $0x118] sm:$0xff]  ;;  %v114_v54 = vld [vmem:[#allocation7 + $0x128] sm:$0xff] }
  0x56   :  { %633 = vmatpush1.bf16.msra.mxu0 %v632_v29  ;;  %662 = vmatpush3.bf16.msra.mxu1 %v661_v30  ;;  %v117_v55 = vld [vmem:[#allocation7 + $0x140] sm:$0xff]  ;;  %v644_v56 = vpack.c.bf16 %v110_v51, %v107_v49  ;;  %v670_v57 = vpack.c.bf16 %v112_v53, %v109_v52  ;;  %v116_v60 = vld [vmem:[#allocation7 + $0x138] sm:$0xff]  ;;  %v115_v61 = vld [vmem:[#allocation7 + $0x130] sm:$0xff] }
  0x57   :  { %635 = vmatprep.subr.bf16.mxu0 %v634_v32  ;;  %663 = vmatprep.subr.bf16.mxu1 %v874_v0  ;;  %v113_v58 = vld [vmem:[#allocation7 + $0x120] sm:$0xff]  ;;  %v646_v59 = vpack.c.bf16 %v117_v55, %v114_v54  ;;  %v118_v62 = vld [vmem:[#allocation7 + $0x148] sm:$0xff]  ;;  %v120_v63 = vld [vmem:[#allocation7 + $0x158] sm:$0xff] }
  0x58   :  { %v123_v2 = vld [vmem:[#allocation7 + $0x170] sm:$0xff]  ;;  %v648_v3 = vpack.c.bf16 %v116_v60, %v113_v58  ;;  %v673_v4 = vpack.c.bf16 %v118_v62, %v115_v61  ;;  %v122_v7 = vld [vmem:[#allocation7 + $0x168] sm:$0xff]  ;;  %v121_v8 = vld [vmem:[#allocation7 + $0x160] sm:$0xff] }
  0x59   :  { %v119_v5 = vld [vmem:[#allocation7 + $0x150] sm:$0xff]  ;;  %v650_v6 = vpack.c.bf16 %v123_v2, %v120_v63  ;;  %v124_v9 = vld [vmem:[#allocation7 + $0x178] sm:$0xff]  ;;  %v284_v10 = vld [vmem:[#allocation8 + $0x8] sm:$0xff] }
  0x5a   :  { %637 = vmatpush1.bf16.msra.mxu0 %v636_v38  ;;  %665 = vmatpush3.bf16.msra.mxu1 %v664_v39  ;;  %v287_v11 = vld [vmem:[#allocation8 + $0x20] sm:$0xff]  ;;  %v652_v12 = vpack.c.bf16 %v122_v7, %v119_v5  ;;  %v676_v13 = vpack.c.bf16 %v124_v9, %v121_v8  ;;  %v286_v16 = vld [vmem:[#allocation8 + $0x18] sm:$0xff]  ;;  %v285_v17 = vld [vmem:[#allocation8 + $0x10] sm:$0xff] }
  0x5b   :  { %639 = vmatprep.subr.bf16.mxu0 %v638_v41  ;;  %666 = vmatprep.subr.bf16.mxu1 %v874_v0  ;;  %v283_v14 = vld [vmem:[#allocation8] sm:$0xff]  ;;  %v678_v15 = vpack.c.bf16 %v287_v11, %v284_v10  ;;  %v288_v18 = vld [vmem:[#allocation8 + $0x28] sm:$0xff]  ;;  %v290_v19 = vld [vmem:[#allocation8 + $0x38] sm:$0xff] }
  0x5c   :  { %v293_v20 = vld [vmem:[#allocation8 + $0x50] sm:$0xff]  ;;  %v680_v22 = vpack.c.bf16 %v286_v16, %v283_v14  ;;  %v711_v23 = vpack.c.bf16 %v288_v18, %v285_v17  ;;  %v292_v26 = vld [vmem:[#allocation8 + $0x48] sm:$0xff]  ;;  %v291_v27 = vld [vmem:[#allocation8 + $0x40] sm:$0xff] }
  0x5d   :  { %v76_v21 = vld [vmem:[#allocation2] sm:$0xff]  ;;  %v682_v25 = vpack.c.bf16 %v293_v20, %v290_v19  ;;  %v294_v28 = vld [vmem:[#allocation8 + $0x58] sm:$0xff]  ;;  %v296_v29 = vld [vmem:[#allocation8 + $0x68] sm:$0xff] }
  0x5e   :  { %641 = vmatpush1.bf16.msra.mxu0 %v640_v47  ;;  %668 = vmatpush3.bf16.msra.mxu1 %v667_v48  ;;  %v289_v24 = vld [vmem:[#allocation8 + $0x30] sm:$0xff]  ;;  %v299_v30 = vld [vmem:[#allocation8 + $0x80] sm:$0xff]  ;;  %v714_v32 = vpack.c.bf16 %v294_v28, %v291_v27  ;;  %v298_v35 = vld [vmem:[#allocation8 + $0x78] sm:$0xff] }
  0x5f   :  { %643 = vmatprep.subr.bf16.mxu0 %v642_v50  ;;  %669 = vmatprep.subr.bf16.mxu1 %v874_v0  ;;  %v684_v31 = vpack.c.bf16 %v292_v26, %v289_v24  ;;  %v295_v33 = vld [vmem:[#allocation8 + $0x60] sm:$0xff]  ;;  %v686_v34 = vpack.c.bf16 %v299_v30, %v296_v29  ;;  %v297_v36 = vld [vmem:[#allocation8 + $0x70] sm:$0xff]  ;;  %v300_v37 = vld [vmem:[#allocation8 + $0x88] sm:$0xff]  ;;  %v127_v26 = vlaneseq }
  0x60   :  { %v302_v38 = vld [vmem:[#allocation8 + $0x98] sm:$0xff]  ;;  %v305_v39 = vld [vmem:[#allocation8 + $0xb0] sm:$0xff]  ;;  %v688_v40 = vpack.c.bf16 %v298_v35, %v295_v33  ;;  %v717_v41 = vpack.c.bf16 %v300_v37, %v297_v36  ;;  %v304_v44 = vld [vmem:[#allocation8 + $0xa8] sm:$0xff] }
  0x61   :  { %v301_v42 = vld [vmem:[#allocation8 + $0x90] sm:$0xff]  ;;  %v690_v43 = vpack.c.bf16 %v305_v39, %v302_v38  ;;  %v303_v45 = vld [vmem:[#allocation8 + $0xa0] sm:$0xff]  ;;  %v306_v46 = vld [vmem:[#allocation8 + $0xb8] sm:$0xff]  ;;  %v128_v27 = vshrl.u32 %v127_v26, 7 }
  0x62   :  { %645 = vmatpush1.bf16.msra.mxu0 %v644_v56  ;;  %671 = vmatpush3.bf16.msra.mxu1 %v670_v57  ;;  %v308_v47 = vld [vmem:[#allocation8 + $0xc8] sm:$0xff]  ;;  %v311_v48 = vld [vmem:[#allocation8 + $0xe0] sm:$0xff]  ;;  %v692_v49 = vpack.c.bf16 %v304_v44, %v301_v42  ;;  %v720_v50 = vpack.c.bf16 %v306_v46, %v303_v45  ;;  %v310_v53 = vld [vmem:[#allocation8 + $0xd8] sm:$0xff] }
  0x63   :  { %647 = vmatprep.subr.bf16.mxu0 %v646_v59  ;;  %672 = vmatprep.subr.bf16.mxu1 %v874_v0  ;;  %v307_v51 = vld [vmem:[#allocation8 + $0xc0] sm:$0xff]  ;;  %v694_v52 = vpack.c.bf16 %v311_v48, %v308_v47  ;;  %v309_v54 = vld [vmem:[#allocation8 + $0xd0] sm:$0xff]  ;;  %v312_v55 = vld [vmem:[#allocation8 + $0xe8] sm:$0xff]  ;;  %v129_v28 = vsub.s32 0, %v128_v27  ;;  %v137_v33 = vsub.s32 2, %v128_v27 }
  0x64   :  { %v314_v56 = vld [vmem:[#allocation8 + $0xf8] sm:$0xff]  ;;  %v317_v57 = vld [vmem:[#allocation8 + $0x110] sm:$0xff]  ;;  %v696_v58 = vpack.c.bf16 %v310_v53, %v307_v51  ;;  %v723_v59 = vpack.c.bf16 %v312_v55, %v309_v54  ;;  %v316_v62 = vld [vmem:[#allocation8 + $0x108] sm:$0xff] }
  0x65   :  { %v313_v60 = vld [vmem:[#allocation8 + $0xf0] sm:$0xff]  ;;  %v698_v61 = vpack.c.bf16 %v317_v57, %v314_v56  ;;  %v315_v63 = vld [vmem:[#allocation8 + $0x100] sm:$0xff]  ;;  %v318_v2 = vld [vmem:[#allocation8 + $0x118] sm:$0xff] }
  0x66   :  { %649 = vmatpush1.bf16.msra.mxu0 %v648_v3  ;;  %674 = vmatpush3.bf16.msra.mxu1 %v673_v4  ;;  %v320_v3 = vld [vmem:[#allocation8 + $0x128] sm:$0xff]  ;;  %v323_v4 = vld [vmem:[#allocation8 + $0x140] sm:$0xff]  ;;  %v700_v5 = vpack.c.bf16 %v316_v62, %v313_v60  ;;  %v322_v9 = vld [vmem:[#allocation8 + $0x138] sm:$0xff] }
  0x67   :  { %651 = vmatprep.subr.bf16.mxu0 %v650_v6  ;;  %675 = vmatprep.subr.bf16.mxu1 %v874_v0  ;;  %v726_v6 = vpack.c.bf16 %v318_v2, %v315_v63  ;;  %v319_v7 = vld [vmem:[#allocation8 + $0x120] sm:$0xff]  ;;  %v702_v8 = vpack.c.bf16 %v323_v4, %v320_v3  ;;  %v321_v10 = vld [vmem:[#allocation8 + $0x130] sm:$0xff]  ;;  %v324_v11 = vld [vmem:[#allocation8 + $0x148] sm:$0xff] }
  0x68   :  { %v704_v14 = vpack.c.bf16 %v322_v9, %v319_v7  ;;  %v325_v16 = vld [vmem:[#allocation8 + $0x150] sm:$0xff]  ;;  %v328_v18 = vld [vmem:[#allocation8 + $0x168] sm:$0xff]  ;;  %v327_v19 = vld [vmem:[#allocation8 + $0x160] sm:$0xff] }
  0x69   :  { %v330_v20 = vld [vmem:[#allocation8 + $0x178] sm:$0xff]  ;;  %v331_v29 = vld [vmem:[%s1007_s5] sm:$0x7] }
  0x6a   :  { %653 = vmatpush1.bf16.msra.mxu0 %v652_v12  ;;  %677 = vmatpush3.bf16.msra.mxu1 %v676_v13  ;;  %v326_v12 = vld [vmem:[#allocation8 + $0x158] sm:$0xff]  ;;  %v329_v13 = vld [vmem:[#allocation8 + $0x170] sm:$0xff]  ;;  %v344_v37 = vrot.slane %v331_v29, %v137_v33 }
  0x6b   :  { %679 = vmatprep.subr.bf16.mxu0 %v678_v15  ;;  %710 = vmatprep.subr.bf16.mxu1 %v874_v0  ;;  %v729_v15 = vpack.c.bf16 %v324_v11, %v321_v10  ;;  %v706_v17 = vpack.c.bf16 %v329_v13, %v326_v12  ;;  %v125_v30 = vld [vmem:[%s1006_s4] sm:$0x7]  ;;  %s877_s4 = smov [#allocation10]  }
  0x6c   :  { %v138_v38 = vrot.slane %v125_v30, %v137_v33  ;;  %s506_s5 = sshll.u32 %s877_s4, 4  ;;  %s507_s5 = int_to_ptr.vmem [resolvable:$true] %s506_s5 }
  0x6d   :  { %207 = vmatmul.mubr.f32.vlgmr.msra.gmra.mrb[0].mxu0 %v76_v21  ;;  %585 = vmatmul.mubr.f32.vlgmr.msra.gmra.mrb[0].mxu1 %v76_v21  ;;  %v708_v21 = vpack.c.bf16 %v328_v18, %v325_v16  ;;  %s838_s22 = scalar_lea.vmem %s507_s5, 128  ;;  %p843_p5 = scmp.lt.s32.totalorder %s507_s5, %s507_s5 }
  0x6e   :  { %681 = vmatpush1.bf16.msra.mxu0 %v680_v22  ;;  %712 = vmatpush3.bf16.msra.mxu1 %v711_v23  ;;  %v732_v22 = vpack.c.bf16 %v330_v20, %v327_v19  ;;  %v75_v23 = vld [vmem:[#allocation5] sm:$0xff]  ;;  %p839_p4 = scmp.ne.s32.totalorder %s507_s5, %s838_s22  ;;  %p844_p6 = scmp.lt.s32.totalorder %s838_s22, %s838_s22 }
  0x6f   :  { %683 = vmatprep.subr.bf16.mxu0 %v682_v25  ;;  %713 = vmatprep.subr.bf16.mxu1 %v874_v0 }
  0x70   :  { %412 = vmatprep.mubr.f32.mxu0 %v875_v1  ;;  %619 = vmatprep.mubr.msk.f32.mxu1 %vm876_vm0, %v875_v1  ;;  %p845_p7 = por %p844_p6, %p843_p5 }
  0x72   :  { %685 = vmatpush1.bf16.msra.mxu0 %v684_v31  ;;  %715 = vmatpush3.bf16.msra.mxu1 %v714_v32  ;;  %v133_v31 = vsub.s32 1, %v128_v27  ;;  %v336_v32 = vrot.slane %v331_v29, %v129_v28  ;;  %p846_p8 = pnand %p845_p7, %p839_p4 }
  0x73   :  { %687 = vmatprep.subr.bf16.mxu0 %v686_v34  ;;  %716 = vmatprep.subr.bf16.mxu1 %v874_v0 }
  0x74   :  { %v134_v34 = vrot.slane %v125_v30, %v133_v31  ;;  %v340_v35 = vrot.slane %v331_v29, %v133_v31 }
  0x76   :  { %689 = vmatpush1.bf16.msra.mxu0 %v688_v40  ;;  %718 = vmatpush3.bf16.msra.mxu1 %v717_v41  ;;  %v736_v41 = vadd.f32 %v340_v35, %v134_v34 }
  0x77   :  { %691 = vmatprep.subr.bf16.mxu0 %v690_v43  ;;  %719 = vmatprep.subr.bf16.mxu1 %v874_v0 }
  0x7a   :  { %693 = vmatpush1.bf16.msra.mxu0 %v692_v49  ;;  %721 = vmatpush3.bf16.msra.mxu1 %v720_v50 }
  0x7b   :  { %695 = vmatprep.subr.bf16.mxu0 %v694_v52  ;;  %722 = vmatprep.subr.bf16.mxu1 %v874_v0 }
  0x7e   :  { %697 = vmatpush1.bf16.msra.mxu0 %v696_v58  ;;  %724 = vmatpush3.bf16.msra.mxu1 %v723_v59 }
  0x7f   :  { %699 = vmatprep.subr.bf16.mxu0 %v698_v61  ;;  %725 = vmatprep.subr.bf16.mxu1 %v874_v0 }
  0x82   :  { %701 = vmatpush1.bf16.msra.mxu0 %v700_v5  ;;  %727 = vmatpush3.bf16.msra.mxu1 %v726_v6 }
  0x83   :  { %703 = vmatprep.subr.bf16.mxu0 %v702_v8  ;;  %728 = vmatprep.subr.bf16.mxu1 %v874_v0 }
  0x86   :  { %705 = vmatpush1.bf16.msra.mxu0 %v704_v14  ;;  %730 = vmatpush3.bf16.msra.mxu1 %v729_v15 }
  0x87   :  { %707 = vmatprep.subr.bf16.mxu0 %v706_v17  ;;  %731 = vmatprep.subr.bf16.mxu1 %v874_v0  ;;  %v130_v0 = vrot.slane %v125_v30, %v129_v28 }
  0x89   :  { %v734_v36 = vadd.f32 %v336_v32, %v130_v0 }
  0x8a   :  { %709 = vmatpush1.bf16.msra.mxu0 %v708_v21  ;;  %733 = vmatpush3.bf16.msra.mxu1 %v732_v22 }
  0x8d   :  { %413 = vmatmul.mubr.f32.vlgmr.msra.gmra.mrb[0].mxu0 %v75_v23  ;;  %620 = vmatmul.mubr.f32.vlgmr.msra.gmra.mrb[2].mxu1 %v75_v23 }
 0x140   :  { %v279_v24 = vpop.f32.mrb[0].mxu1 }
 0x141   :  { %v586_v25 = vpop.f32.mrb[1].mxu1  ;;  %v280_v46 = vadd.f32 %v279_v24, %v138_v38 }
 0x160   :  { %v414_v39 = vpop.f32.mrb[0].mxu0  ;;  %v485_v40 = vpop.f32.mrb[2].mxu1 }
 0x161   :  { %v735_v42 = vadd.f32 %v734_v36, %v414_v39  ;;  %v486_v43 = vadd.f32 %v485_v40, %v344_v37  ;;  %v416_v44 = vpop.f32.mrb[1].mxu0  ;;  %v621_v45 = vpop.f32.mrb[3].mxu1 }
 0x162   :  { %v737_v48 = vadd.f32 %v736_v41, %v416_v44 }
 0x163   :  { %vm491_vm1 = vcmp.ge.f32.partialorder %v735_v42, 0.0 }
 0x164   :  { %v492_v47 = vsel %vm491_vm1, %v486_v43, 0.0  ;;  %vm497_vm3 = vcmp.ge.f32.partialorder %v737_v48, 0.0 }
 0x165   :  { %v493_v49 = vadd.f32 %v492_v47, %v280_v46 }
 0x167   :  { %vm494_vm2 = vcmp.ge.f32.partialorder %v493_v49, 0.0 }
 0x168   :  { %v517_v50 = vsel %vm494_vm2, 1.0, %v875_v1 }
 0x169   :  { %v498_v51 = vsel %vm497_vm3, %v75_v23, %v517_v50 }
 0x16a   :  { %499 = vst [vmem:[#allocation10] sm:$0xff] %v498_v51 }
 0x16b   :  { %849 = shalt.err (!%p846_p8)
}
 0x16c   :  { %s850_s26 = scalar_lea.hbm %s1008_s6, 128 }
 0x16d   :  { %p851_p9 = scmp.ne.s32.totalorder %s1008_s6, %s850_s26  ;;  %p854_p10 = scmp.lt.u32.totalorder %s850_s26, %s1008_s6 }
 0x16f   :  { %p856_p11 = pnand %p854_p10, %p851_p9 }
 0x171   :  { %859 = shalt.err (!%p856_p11)
}
 0x172   :  { %509 = dma.vmem_to_hbm [thread:$0]  %s507_s5, 128, %s1008_s6, [#allocation4]  }
 0x173   :  { %866 = dma.done.wait [#allocation4], 128  }
 0x174   :  { %867 = vsyncadd [#allocation4], 4294967168 }
 0x175   :  { %513 = vsyncpa [#allocation3], 1 }
 0x176   :  { %514 = vsyncpa [#allocation6], 1 }
 0x177   :  { %515 = vsyncpa [#allocation9], 1 }
 0x178   :  { %516 = vsyncpa [#allocation4], 1 }

</bundles_post_ra>
